<compile_context>
chip_gen: v7x
topology: tpu7x:2x2x1
jax: 0.10.0
libtpu: 0.0.40
codegen_flags: <defaults>
</compile_context>

<pallas_src>
import math
import functools

import jax
import jax.numpy as jnp
from jax.experimental import pallas as pl
from jax.experimental.pallas import tpu as pltpu


# --- activation registry (mirrors XDPX activations / activation_coeffs) ---
# gelu uses the exact erf form to match PyTorch nn.GELU's default.
_ACTIVATIONS = {
    "linear": lambda x: x,
    "relu": lambda x: jnp.maximum(x, 0.0),
    "gelu": lambda x: jax.nn.gelu(x, approximate=False),
    "tanh": jnp.tanh,
    "sigmoid": jax.nn.sigmoid,
}
_ACTIVATION_COEFFS = {
    "linear": 1.0,
    "relu": math.sqrt(2.0),
    "gelu": math.sqrt(2.0),
    "tanh": 5.0 / 3.0,
    "sigmoid": 1.0,
}
_TRANSCENDENTAL_ACTS = ("gelu", "tanh", "sigmoid")


def _round_up(x, m):
    return (x + m - 1) // m * m


# ----------------------------- kernels -----------------------------
def _kernel_single_k(x_ref, w_ref, s_ref, b_ref, o_ref, *, activation):
    """Single K step: no accumulator scratch, one store per output tile."""
    y = jnp.dot(x_ref[...], w_ref[...], preferred_element_type=jnp.float32)
    y = y * s_ref[...] + b_ref[...]
    o_ref[...] = _ACTIVATIONS[activation](y).astype(o_ref.dtype)


def _kernel_multi_k_f32(x_ref, w_ref, s_ref, b_ref, o_ref, *, activation):
    """Multi K step, f32 output: accumulate directly in the resident output block."""
    k = pl.program_id(2)

    @pl.when(k == 0)
    def _():
        o_ref[...] = jnp.zeros_like(o_ref)

    o_ref[...] += jnp.dot(x_ref[...], w_ref[...], preferred_element_type=jnp.float32)

    @pl.when(k == pl.num_programs(2) - 1)
    def _():
        y = o_ref[...] * s_ref[...] + b_ref[...]
        o_ref[...] = _ACTIVATIONS[activation](y).astype(o_ref.dtype)


def _kernel_multi_k(x_ref, w_ref, s_ref, b_ref, o_ref, acc_ref, *, activation):
    """Multi K step, non-f32 output: f32 VMEM accumulator, cast once at the end."""
    k = pl.program_id(2)

    @pl.when(k == 0)
    def _():
        acc_ref[...] = jnp.zeros_like(acc_ref)

    acc_ref[...] += jnp.dot(x_ref[...], w_ref[...], preferred_element_type=jnp.float32)

    @pl.when(k == pl.num_programs(2) - 1)
    def _():
        y = acc_ref[...] * s_ref[...] + b_ref[...]
        o_ref[...] = _ACTIVATIONS[activation](y).astype(o_ref.dtype)


# --------------------------- weight prep ---------------------------
def prepare_params(v, g, b=None, *, mxu_dtype=None):
    """One-time, weight-stationary preparation (hoisted out of the hot path).

    v: (Dout, Din)  g: (Dout,)  b: (Dout,) or None
    Returns:
      wt    : (Din, Dout) V^T in the MXU operand dtype (bf16 by default for f32 V)
      scale : (1, Dout) f32, g / ||V||_row  (folds the weight_norm reparam)
      bias  : (1, Dout) f32
    """
    Dout, Din = v.shape
    v32 = jnp.asarray(v, jnp.float32)
    norm = jnp.sqrt(jnp.sum(v32 * v32, axis=1))          # zero rows -> NaN, same as PyTorch
    scale = (jnp.asarray(g, jnp.float32).reshape(Dout) / norm).reshape(1, Dout)
    bias = (jnp.zeros((1, Dout), jnp.float32) if b is None
            else jnp.asarray(b, jnp.float32).reshape(1, Dout))
    if mxu_dtype is None:
        mxu_dtype = jnp.bfloat16 if v.dtype == jnp.float32 else v.dtype
    wt = jnp.asarray(v).T.astype(mxu_dtype)               # one-time transpose/cast
    return wt, scale, bias


# ----------------------------- wrapper -----------------------------
def linear_projection_apply(x, wt, scale, bias, activation="linear", *,
                            tm=512, tn=512, tk=1024):
    """out = activation(x @ (V^T scaled by g/||V||) + b), using prepared weights.

    x: (B, Din)   wt: (Din, Dout)   scale, bias: (1, Dout) f32
    Returns (B, Dout) in x.dtype.
    """
    B, Din = x.shape
    Din_w, Dout = wt.shape
    assert Din_w == Din, "wt must be (in_features, out_features) = V^T"
    out_dtype = x.dtype
    op_dtype = wt.dtype
    op_isz = jnp.dtype(op_dtype).itemsize
    out_isz = jnp.dtype(out_dtype).itemsize

    # Sublane packing for the M clamp: bf16 -> 16, int8/fp8 -> 32, else 8.
    m_align = {1: 32, 2: 16}.get(op_isz, 8)

    # (8,128)-aligned tiles, clamped to the (padded) problem size.
    tm = min(tm, _round_up(B, m_align))
    tn = min(tn, _round_up(Dout, 128))
    tk = min(tk, _round_up(Din, 128))

    # Megacore (v7x): if there's only one (M, N) tile, split N so both TCs get work.
    if B <= tm and Dout <= tn and _round_up(Dout, 128) >= 256:
        tn = _round_up(_round_up(Dout, 128) // 2, 128)

    Mp = _round_up(B, tm)
    Np = _round_up(Dout, tn)
    Kp = _round_up(Din, tk)
    m_tiles, n_tiles, k_tiles = Mp // tm, Np // tn, Kp // tk

    # Skip padded copies when shapes are already aligned and dtypes already match.
    if Mp == B and Kp == Din and x.dtype == op_dtype:
        xp = x
    else:
        xp = jnp.zeros((Mp, Kp), op_dtype).at[:B, :Din].set(x.astype(op_dtype))
    if Kp == Din and Np == Dout:
        wp = wt
    else:
        wp = jnp.zeros((Kp, Np), op_dtype).at[:Din, :Dout].set(wt)
    if Np == Dout:
        sp, bp = scale, bias
    else:
        sp = jnp.zeros((1, Np), jnp.float32).at[:, :Dout].set(scale)
        bp = jnp.zeros((1, Np), jnp.float32).at[:, :Dout].set(bias)

    single_k = (k_tiles == 1)
    acc_in_out = (not single_k) and (jnp.dtype(out_dtype) == jnp.float32)
    use_scratch = (not single_k) and (not acc_in_out)

    # Explicit VMEM budget (double-buffered tiles + accumulator), capped per generation.
    need = 2 * (tm * tk + tk * tn) * op_isz            # x / W tiles (double-buffered)
    need += 2 * 2 * tn * 4                             # scale + bias tiles
    need += 2 * tm * tn * out_isz                      # output tile
    need += tm * tn * 4 if use_scratch else 0          # f32 accumulator scratch
    try:
        cap = int(getattr(pltpu.get_tpu_info(), "vmem_capacity_bytes", 64 << 20))
    except Exception:  # pragma: no cover - conservative fallback (v7x per-TC)
        cap = 64 << 20
    vmem_limit = int(min(cap * 3 // 4, max(2 * need, 32 << 20)))
    vmem_limit = max(vmem_limit, need + (2 << 20))

    flops = 2 * Mp * Np * Kp + 3 * Mp * Np
    transcendentals = Mp * Np if activation in _TRANSCENDENTAL_ACTS else 0
    bytes_accessed = (Mp * Kp * op_isz * n_tiles + Kp * Np * op_isz * m_tiles
                      + Mp * Np * out_isz + 2 * Np * 4)
    cost = pl.CostEstimate(flops=flops, transcendentals=transcendentals,
                           bytes_accessed=bytes_accessed)

    if single_k:
        kernel = functools.partial(_kernel_single_k, activation=activation)
        grid = (m_tiles, n_tiles)
        in_specs = [
            pl.BlockSpec((tm, tk), lambda i, j: (i, 0)),   # x
            pl.BlockSpec((tk, tn), lambda i, j: (0, j)),   # W = V^T (K, N) layout
            pl.BlockSpec((1, tn), lambda i, j: (0, j)),    # scale
            pl.BlockSpec((1, tn), lambda i, j: (0, j)),    # bias
        ]
        out_spec = pl.BlockSpec((tm, tn), lambda i, j: (i, j))
        scratch = []
        semantics = ("parallel", "parallel")
    else:
        grid = (m_tiles, n_tiles, k_tiles)
        in_specs = [
            pl.BlockSpec((tm, tk), lambda i, j, k: (i, k)),   # x
            pl.BlockSpec((tk, tn), lambda i, j, k: (k, j)),   # W = V^T (K, N) layout
            pl.BlockSpec((1, tn), lambda i, j, k: (0, j)),    # scale
            pl.BlockSpec((1, tn), lambda i, j, k: (0, j)),    # bias
        ]
        out_spec = pl.BlockSpec((tm, tn), lambda i, j, k: (i, j))
        semantics = ("parallel", "parallel", "arbitrary")
        if acc_in_out:
            kernel = functools.partial(_kernel_multi_k_f32, activation=activation)
            scratch = []
        else:
            kernel = functools.partial(_kernel_multi_k, activation=activation)
            scratch = [pltpu.VMEM((tm, tn), jnp.float32)]

    out = pl.pallas_call(
        kernel,
        out_shape=jax.ShapeDtypeStruct((Mp, Np), out_dtype),
        grid_spec=pltpu.PrefetchScalarGridSpec(
            num_scalar_prefetch=0,
            grid=grid,
            in_specs=in_specs,
            out_specs=out_spec,
            scratch_shapes=scratch,
        ),
        compiler_params=pltpu.CompilerParams(
            dimension_semantics=semantics,
            vmem_limit_bytes=vmem_limit),
        cost_estimate=cost,
    )(xp, wp, sp, bp)

    if Mp != B or Np != Dout:
        out = out[:B, :Dout]
    return out


def linear_projection(x, v, g, b=None, activation="linear", *,
                      mxu_dtype=None, tm=512, tn=512, tk=1024):
    """Convenience per-call path. For weight-stationary usage, call prepare_params()
    once and reuse its outputs with linear_projection_apply()."""
    wt, scale, bias = prepare_params(v, g, b, mxu_dtype=mxu_dtype)
    return linear_projection_apply(x, wt, scale, bias, activation, tm=tm, tn=tn, tk=tk)


# --------------------------- init / reference ---------------------------
def init_params(key, in_features, out_features, activation="linear", bias=True):
    """Matches LinearProjection.__init__ + weight_norm parametrization (V, g, b)."""
    coeff = _ACTIVATION_COEFFS[activation]
    std = math.sqrt(1.0 / in_features) * coeff
    kv, kg = jax.random.split(key)
    v = jax.random.normal(kv, (out_features, in_features), jnp.float32) * std
    norm = jnp.sqrt(jnp.sum(v * v, axis=1))
    # weight_norm init sets g = ||V||_row; perturb so the folded scale != 1 and the
    # scale path is genuinely exercised.
    g = norm * (1.0 + 0.25 * jax.random.uniform(kg, (out_features,)))
    b = jnp.zeros((out_features,), jnp.float32) if bias else None
    return v, g, b


def _reference(x, v, g, b, activation):
    norm = jnp.sqrt(jnp.sum(v * v, axis=1, keepdims=True))
    w = v * (g.reshape(-1, 1) / norm)
    y = x @ w.T
    if b is not None:
        y = y + b.reshape(1, -1)
    return _ACTIVATIONS[activation](y)


if __name__ == "__main__":
    key = jax.random.PRNGKey(0)
    k1, k2, k3, k4 = jax.random.split(key, 4)

    # Case 1: aligned shapes, f32 MXU operands, weights prepared ONCE (hoisted) and
    # reused; tk=128 forces the multi-K accumulate-in-output path.
    B, Din, Dout = 16, 256, 128
    x = jax.random.normal(k1, (B, Din), jnp.float32)
    v, g, b = init_params(k2, Din, Dout, activation="linear", bias=True)
    wt, scale, bias = prepare_params(v, g, b, mxu_dtype=jnp.float32)
    ref = _reference(x, v, g, b, "linear")

    out = jax.block_until_ready(
        linear_projection_apply(x, wt, scale, bias, "linear", tk=128))
    assert out.shape == (B, Dout)
    assert jnp.allclose(out, ref, atol=1e-4, rtol=1e-4), "f32 multi-K mismatch"

    out_b = jax.block_until_ready(
        linear_projection_apply(x, wt, scale, bias, "linear"))   # single-K path, same weights
    assert jnp.allclose(out_b, ref, atol=1e-4, rtol=1e-4), "f32 single-K mismatch"

    # Case 2: non-128-aligned shapes (padding path) with exact-erf gelu.
    B2, Din2, Dout2 = 8, 96, 72
    x2 = jax.random.normal(k3, (B2, Din2), jnp.float32)
    v2, g2, b2 = init_params(k4, Din2, Dout2, activation="gelu", bias=True)
    out2 = jax.block_until_ready(
        linear_projection(x2, v2, g2, b2, activation="gelu", mxu_dtype=jnp.float32))
    ref2 = _reference(x2, v2, g2, b2, "gelu")
    assert out2.shape == (B2, Dout2)
    assert jnp.allclose(out2, ref2, atol=1e-4, rtol=1e-4), "gelu (padded) mismatch"

    # Case 3: default bf16 MXU operands (f32 accumulation / f32 epilogue), looser tol.
    out3 = jax.block_until_ready(linear_projection(x, v, g, b, activation="linear"))
    assert jnp.allclose(out3, ref, atol=3e-2, rtol=3e-2), "bf16-operand mismatch"

    print("KERNEL_OK")
</pallas_src>

<mosaic_0001>
module attributes {stable_mosaic.version = 11 : i64} {
  func.func @_kernel_multi_k_f32(%arg0: i32, %arg1: i32, %arg2: i32, %arg3: memref<16x128xf32, #tpu.memory_space<vmem>>, %arg4: memref<128x128xf32, #tpu.memory_space<vmem>>, %arg5: memref<1x128xf32, #tpu.memory_space<vmem>>, %arg6: memref<1x128xf32, #tpu.memory_space<vmem>>, %arg7: memref<16x128xf32, #tpu.memory_space<vmem>>) attributes {dimension_semantics = [#tpu.dimension_semantics<parallel>, #tpu.dimension_semantics<parallel>, #tpu.dimension_semantics<arbitrary>], iteration_bounds = array<i64: 1, 1, 2>, scalar_prefetch = 0 : i64, scratch_operands = 0 : i64, tpu.core_type = #tpu.core_type<tc>, window_params = [{transform_indices = @transform_0, window_bounds = array<i64: 16, 128>}, {transform_indices = @transform_1, window_bounds = array<i64: 128, 128>}, {transform_indices = @transform_2, window_bounds = array<i64: 1, 128>}, {transform_indices = @transform_3, window_bounds = array<i64: 1, 128>}, {transform_indices = @transform_4, window_bounds = array<i64: 16, 128>}]} {
    %c0_i32 = arith.constant 0 : i32
    %0 = arith.cmpi eq, %arg2, %c0_i32 : i32
    %1 = arith.extui %0 : i1 to i32
    %c0_i32_0 = arith.constant 0 : i32
    %2 = arith.cmpi ne, %1, %c0_i32_0 : i32
    scf.if %2 {
      %cst_9 = arith.constant 0.000000e+00 : f32
      %12 = vector.broadcast %cst_9 : f32 to vector<16x128xf32>
      %c0_10 = arith.constant 0 : index
      %c0_11 = arith.constant 0 : index
      %13 = vector.load %arg7[%c0_10, %c0_11] : memref<16x128xf32, #tpu.memory_space<vmem>>, vector<16x128xf32>
      tpu.vector_store %arg7[%c0_10, %c0_11], %12 {strides = array<i32>} : memref<16x128xf32, #tpu.memory_space<vmem>>, vector<16x128xf32>,
    } else {
    }
    %c0 = arith.constant 0 : index
    %c0_1 = arith.constant 0 : index
    %3 = vector.load %arg7[%c0, %c0_1] : memref<16x128xf32, #tpu.memory_space<vmem>>, vector<16x128xf32>
    %c0_2 = arith.constant 0 : index
    %c0_3 = arith.constant 0 : index
    %4 = vector.load %arg3[%c0_2, %c0_3] : memref<16x128xf32, #tpu.memory_space<vmem>>, vector<16x128xf32>
    %c0_4 = arith.constant 0 : index
    %c0_5 = arith.constant 0 : index
    %5 = vector.load %arg4[%c0_4, %c0_5] : memref<128x128xf32, #tpu.memory_space<vmem>>, vector<128x128xf32>
    %cst = arith.constant dense<0.000000e+00> : vector<16x128xf32>
    %6 = tpu.matmul %4, %5, %cst {dimension_numbers = #tpu.dot_dimension_numbers<[1], [0], [0], [1], [0, 0, 1, 1], [], []>} : vector<16x128xf32>, vector<128x128xf32>, vector<16x128xf32> -> vector<16x128xf32>
    %7 = arith.addf %3, %6 : vector<16x128xf32>
    %c0_6 = arith.constant 0 : index
    %c0_7 = arith.constant 0 : index
    %8 = vector.load %arg7[%c0_6, %c0_7] : memref<16x128xf32, #tpu.memory_space<vmem>>, vector<16x128xf32>
    tpu.vector_store %arg7[%c0_6, %c0_7], %7 {strides = array<i32>} : memref<16x128xf32, #tpu.memory_space<vmem>>, vector<16x128xf32>,
    %c1_i32 = arith.constant 1 : i32
    %9 = arith.cmpi eq, %arg2, %c1_i32 : i32
    %10 = arith.extui %9 : i1 to i32
    %c0_i32_8 = arith.constant 0 : i32
    %11 = arith.cmpi ne, %10, %c0_i32_8 : i32
    scf.if %11 {
      %c0_9 = arith.constant 0 : index
      %c0_10 = arith.constant 0 : index
      %12 = vector.load %arg7[%c0_9, %c0_10] : memref<16x128xf32, #tpu.memory_space<vmem>>, vector<16x128xf32>
      %c0_11 = arith.constant 0 : index
      %c0_12 = arith.constant 0 : index
      %13 = vector.load %arg5[%c0_11, %c0_12] : memref<1x128xf32, #tpu.memory_space<vmem>>, vector<1x128xf32>
      %14 = vector.broadcast %13 : vector<1x128xf32> to vector<16x128xf32>
      %15 = arith.mulf %12, %14 : vector<16x128xf32>
      %c0_13 = arith.constant 0 : index
      %c0_14 = arith.constant 0 : index
      %16 = vector.load %arg6[%c0_13, %c0_14] : memref<1x128xf32, #tpu.memory_space<vmem>>, vector<1x128xf32>
      %17 = vector.broadcast %16 : vector<1x128xf32> to vector<16x128xf32>
      %18 = arith.addf %15, %17 : vector<16x128xf32>
      %c0_15 = arith.constant 0 : index
      %c0_16 = arith.constant 0 : index
      %19 = vector.load %arg7[%c0_15, %c0_16] : memref<16x128xf32, #tpu.memory_space<vmem>>, vector<16x128xf32>
      tpu.vector_store %arg7[%c0_15, %c0_16], %18 {strides = array<i32>} : memref<16x128xf32, #tpu.memory_space<vmem>>, vector<16x128xf32>,
    } else {
    }
    return
  }
  func.func @transform_0(%arg0: i32, %arg1: i32, %arg2: i32) -> (i32, i32) {
    %c0_i32 = arith.constant 0 : i32
    return %arg0, %arg2 : i32, i32
  }
  func.func @transform_1(%arg0: i32, %arg1: i32, %arg2: i32) -> (i32, i32) {
    %c0_i32 = arith.constant 0 : i32
    return %arg2, %arg1 : i32, i32
  }
  func.func @transform_2(%arg0: i32, %arg1: i32, %arg2: i32) -> (i32, i32) {
    %c0_i32 = arith.constant 0 : i32
    %c0_i32_0 = arith.constant 0 : i32
    return %c0_i32, %arg1 : i32, i32
  }
  func.func @transform_3(%arg0: i32, %arg1: i32, %arg2: i32) -> (i32, i32) {
    %c0_i32 = arith.constant 0 : i32
    %c0_i32_0 = arith.constant 0 : i32
    return %c0_i32, %arg1 : i32, i32
  }
  func.func @transform_4(%arg0: i32, %arg1: i32, %arg2: i32) -> (i32, i32) {
    %c0_i32 = arith.constant 0 : i32
    return %arg0, %arg1 : i32, i32
  }
}

</mosaic_0001>

<bundles_post_ra>
// kernel: tpu_custom_call.1
= control target key start
LH: loop header
LB: loop body
LE: loop exit
PB: predicated region body
PF: predicated region fallthrough
CT: control target
= control target key end

     0   :  { %9 = vsyncpa [#allocation3], 0  ;;  %s1163_s0 = inlined_call_operand.hbm [shape: f32[16,256], index: 0, kind: input, shape index: {}]   ;;  %s1164_s1 = inlined_call_operand.hbm [shape: f32[256,128], index: 1, kind: input, shape index: {}]   ;;  %s1165_s2 = inlined_call_operand.vmem [shape: f32[1,128], index: 2, kind: input, shape index: {}]   ;;  %s1166_s3 = inlined_call_operand.vmem [shape: f32[1,128], index: 3, kind: input, shape index: {}]   ;;  %s1167_s4 = inlined_call_operand.hbm [shape: f32[16,128], index: 4, kind: output, shape index: {}]  }
   0x1   :  { %11 = vsyncpa [#allocation3 + $0x1], 0 }
   0x2   :  { %12 = vsyncpa [#allocation6], 0 }
   0x3   :  { %14 = vsyncpa [#allocation6 + $0x1], 0 }
   0x4   :  { %15 = vsyncpa [#allocation4], 0  ;;  %s929_s15 = smov 0   ;;  %s931_s16 = smov 0  }
   0x5   :  { %s933_s17 = smov 0   ;;  %s935_s18 = smov 0  }
   0x6   :  { %s937_s19 = smov 0   ;;  %s939_s20 = smov 0  }
   0x7 LB: > { %s569_s21 = sadd.s32 4294967295, %s893_s20   ;;  %s33_s22 = sadd.s32 1, %s889_s19  ;;  %s893_s20 = sphi %s939_s20, %s21_s20   ;;  %s889_s19 = sphi %s937_s19, %s1180_s19   ;;  %s885_s18 = sphi %s935_s18, %s1179_s18   ;;  %s881_s17 = sphi %s933_s17, %s1178_s17   ;;  %s877_s16 = sphi %s931_s16, %s1177_s16   ;;  %s873_s15 = sphi %s929_s15, %s1176_s15  }
   0x8   : > { %p34_p0 = scmp.ge.s32.totalorder %s33_s22, 2  ;;  %s49_s23 = sadd.s32 1, %s881_s17 }
   0x9   : > { %p56_p1 = scmp.ne.s32.totalorder %s881_s17, %s877_s16  ;;  %p57_p2 = scmp.eq.s32.totalorder %s893_s20, 0 }
   0xa   : > { %s1182_s22 = smov (%p34_p0, %s33_s22), 0  ;;  %p62_p4 = scmp.ne.s32.totalorder %s877_s16, %s873_s15 }
   0xb   : > { %p965_p3 = por %p57_p2, %p56_p1  ;;  %s45_s25 = ssub.s32 %s889_s19, %s1182_s22 }
   0xc   : > { %p63_p5 = scmp.eq.s32.totalorder %s569_s21, 0  ;;  %p47_p6 = scmp.eq.s32.totalorder %s45_s25, 0 }
   0xd   : > { %p691_p8 = scmp.lt.s32.totalorder %s893_s20, 2  ;;  %s983_s28 = sand.u32 1, %s881_s17  }
   0xe   : > { %p974_p7 = por %p63_p5, %p62_p4  ;;  %s575_s29 = sshll.u32 %s889_s19, 7 }
   0xf   : > { %s980_s27 = scalar_select %p47_p6, %s881_s17, %s49_s23  }
  0x10   : > { %s1170_s26 = scalar_select %p974_p7, 1, 0 }
  0x11   : > { %s574_s30 = sshll.u32 %s983_s28, 4  ;;  %s990_s7 = scalar_lea.hbm %s1163_s0, %s575_s29 }
  0x12   : > { %s210_s8 = scalar_lea.vmem [#allocation2], %s574_s30  ;;  %p994_p9 = pnand %p691_p8, %p965_p3 }
  0x13   : > { %s219_s9 = sshll.u32 %s210_s8, 4  ;;  %s207_s11 = scalar_lea.sflag [#allocation3], %s983_s28  ;;  %s998_s9 = int_to_ptr.vmem [resolvable:$true] %s219_s9 }
  0x14   : > { %s749_s12 = scalar_lea.hbm %s990_s7, 256  ;;  %p751_p12 = pneg %p994_p9 }
  0x15   : > { %p750_p11 = scmp.ne.s32.totalorder %s990_s7, %s749_s12  ;;  %s754_s15 = scalar_lea.hbm %s1163_s0, 512 }
  0x16   : > { %p755_p1 = scmp.lt.u32.totalorder %s990_s7, %s1163_s0  ;;  %p756_p2 = scmp.lt.u32.totalorder %s754_s15, %s749_s12 }
  0x17   : > { %p752_p13 = pnand %p751_p12, %p750_p11  ;;  %p758_p4 = scmp.lt.u32.totalorder %s749_s12, %s990_s7 }
  0x18   : > { %p757_p3 = por %p756_p2, %p755_p1 }
  0x19   : > { %p753_p0 = pneg %p752_p13 }
  0x1a   : > { %p759_p5 = por %p758_p4, %p757_p3 }
  0x1c   : > { %p760_p6 = pnand %p759_p5, %p753_p0 }
  0x1e   : > { %763 = shalt.err (!%p760_p6)
}
  0x1f   : > { %s764_s25 = scalar_lea.vmem %s998_s9, 256  ;;  %s895_s29 = smov [#allocation2]  }
  0x20   : > { %p765_p8 = scmp.ne.s32.totalorder %s998_s9, %s764_s25  ;;  %s769_s30 = sshll.u32 %s895_s29, 4  ;;  %s770_s30 = int_to_ptr.vmem [resolvable:$false] %s769_s30 }
  0x21   : > { %s771_s5 = scalar_lea.vmem %s770_s30, 512  ;;  %p772_p10 = scmp.lt.s32.totalorder %s998_s9, %s770_s30 }
  0x22   : > { %p767_p11 = pnand %p765_p8, %p751_p12  ;;  %p773_p1 = scmp.lt.s32.totalorder %s771_s5, %s764_s25 }
  0x24   : > { %p768_p13 = pneg %p767_p11  ;;  %p774_p2 = por %p773_p1, %p772_p10 }
  0x26   : > { %p775_p3 = pnand %p774_p2, %p768_p13 }
  0x28   : > { %778 = shalt.err (!%p775_p3)
}
  0x29   : > { %s896_s6 = smov 256   ;;  %s897_s8 = smov 128  }
  0x2a   : > { %s898_s12 = smov 8   ;;  %p249_p10 = scmp.lt.s32.totalorder %s893_s20, 3 }
  0x2b   : > { %687 = dma.hbm_to_vmem [thread:$0]  (!%p994_p9), %s990_s7, 256, %s998_s9, %s207_s11, %s896_s6, %s897_s8, %s898_s12  }
  0x2c   : > { %s576_s13 = sshll.u32 %s983_s28, 7  ;;  %s590_s14 = sshll.u32 %s889_s19, 11 }
  0x2d   : > { %p1172_p0 = scmp.ge.s32.totalorder %s893_s20, 1  ;;  %s1043_s25 = scalar_lea.hbm %s1164_s1, %s590_s14 }
  0x2e   : > { %s233_s29 = scalar_lea.vmem [#allocation5], %s576_s13  ;;  %s230_s7 = scalar_lea.sflag [#allocation6], %s983_s28 }
  0x2f   : > { %p1036_p4 = pnand %p1172_p0, %p249_p10  ;;  %s241_s30 = sshll.u32 %s233_s29, 4  ;;  %s1045_s30 = int_to_ptr.vmem [resolvable:$true] %s241_s30 }
  0x30   : > { %s779_s9 = scalar_lea.hbm %s1043_s25, 2048  ;;  %s784_s6 = scalar_lea.hbm %s1164_s1, 4096 }
  0x31   : > { %p780_p5 = scmp.ne.s32.totalorder %s1043_s25, %s779_s9  ;;  %p785_p11 = scmp.lt.u32.totalorder %s1043_s25, %s1164_s1 }
  0x32   : > { %p786_p13 = scmp.lt.u32.totalorder %s784_s6, %s779_s9  ;;  %p788_p2 = scmp.lt.u32.totalorder %s779_s9, %s1043_s25 }
  0x33   : > { %p782_p6 = pnand %p780_p5, %p751_p12 }
  0x34   : > { %p787_p1 = por %p786_p13, %p785_p11 }
  0x35   : > { %p783_p8 = pneg %p782_p6 }
  0x36   : > { %p789_p3 = por %p788_p2, %p787_p1 }
  0x38   : > { %p790_p10 = pnand %p789_p3, %p783_p8 }
  0x3a   : > { %793 = shalt.err (!%p790_p10)
}
  0x3b   : > { %s794_s13 = scalar_lea.vmem %s1045_s30, 2048  ;;  %s899_s24 = smov [#allocation5]  }
  0x3c   : > { %p795_p0 = scmp.ne.s32.totalorder %s1045_s30, %s794_s13  ;;  %s799_s29 = sshll.u32 %s899_s24, 4  ;;  %s800_s29 = int_to_ptr.vmem [resolvable:$false] %s799_s29 }
  0x3d   : > { %s801_s11 = scalar_lea.vmem %s800_s29, 4096  ;;  %p802_p7 = scmp.lt.s32.totalorder %s1045_s30, %s800_s29 }
  0x3e   : > { %p797_p5 = pnand %p795_p0, %p751_p12  ;;  %p803_p11 = scmp.lt.s32.totalorder %s801_s11, %s794_s13 }
  0x40   : > { %p798_p6 = pneg %p797_p5  ;;  %p804_p13 = por %p803_p11, %p802_p7 }
  0x42   : > { %p805_p1 = pnand %p804_p13, %p798_p6 }
  0x44   : > { %808 = shalt.err (!%p805_p1)
}
  0x45   : > { %690 = dma.hbm_to_vmem [thread:$0]  (!%p994_p9), %s1043_s25, 2048, %s1045_s30, %s230_s7, %s897_s8, %s897_s8, %s898_s12  }
  0x46   : > { %253 = sbr.rel (%p1036_p4) target bundleno = 379 (0x17b), region = 36  ;;  %s255_s9 = sand.u32 (!%p1036_p4), 1, %s877_s16  }
  0x47   : > { %s580_s5 = sshll.u32 (!%p1036_p4), %s255_s9, 4  ;;  %s256_s6 = scalar_lea.sflag (!%p1036_p4), [#allocation3], %s255_s9 }
  0x48   : > { %s1079_s14 = scalar_lea.vmem (!%p1036_p4), [#allocation2], %s580_s5  ;;  %p1174_p7 = scmp.ne.s32.totalorder (!%p1036_p4), %s1170_s26, 0 }
  0x4d   : > { %860 = dma.done.wait (%p1174_p7), %s256_s6, 256  }
  0x4e   : > { %862 = vsyncadd (%p1174_p7), %s256_s6, 4294967040  ;;  %s581_s28 = sshll.u32 %s255_s9, 7  ;;  %s265_s10 = scalar_lea.sflag [#allocation6], %s255_s9 }
  0x4f   : > { %s1085_s23 = scalar_lea.vmem [#allocation5], %s581_s28 }
  0x50   : > { %864 = dma.done.wait (%p1174_p7), %s265_s10, 2048  }
  0x51   : > { %866 = vsyncadd (%p1174_p7), %s265_s10, 4294965248  ;;  %p582_p9 = scmp.ne.s32.totalorder %s885_s18, 0 }
  0x52   : > { %v900_v0 = vmov (!%p582_p9), 0.0  }
  0x53   : > { %311 = sbr.rel (%p582_p9) target bundleno = 90 (0x5a), region = 48  ;;  %312 = vst [vmem:[#allocation7] sm:$0xff] (!%p582_p9), %v900_v0  ;;  %313 = vst [vmem:[#allocation7 + $0x8] sm:$0xff] (!%p582_p9), %v900_v0 }
  0x5a PF: > { %v318_v1 = vld [vmem:[%s1085_s23] sm:$0xff]  ;;  %v319_v2 = vld [vmem:[%s1085_s23 + $0x8] sm:$0xff]  ;;  %v320_v3 = vld [vmem:[%s1085_s23 + $0x10] sm:$0xff]  ;;  %p583_p12 = scmp.ne.s32.totalorder %s885_s18, 1 }
  0x5b   : > { %v644_v4 = vpack.c.bf16 %v319_v2, %v318_v1  ;;  %v321_v5 = vld [vmem:[%s1085_s23 + $0x18] sm:$0xff]  ;;  %v322_v7 = vld [vmem:[%s1085_s23 + $0x20] sm:$0xff]  ;;  %v323_v8 = vld [vmem:[%s1085_s23 + $0x28] sm:$0xff] }
  0x5c   : > { %v648_v6 = vpack.c.bf16 %v321_v5, %v320_v3  ;;  %v652_v9 = vpack.c.bf16 %v323_v8, %v322_v7  ;;  %v316_v10 = vld [vmem:[%s1079_s14] sm:$0xff]  ;;  %v325_v12 = vld [vmem:[%s1085_s23 + $0x38] sm:$0xff]  ;;  %v327_v15 = vld [vmem:[%s1085_s23 + $0x48] sm:$0xff] }
  0x5d   : > { %645 = vmatprep.subr.bf16.mxu0 %v644_v4  ;;  %v324_v11 = vld [vmem:[%s1085_s23 + $0x30] sm:$0xff]  ;;  %641 = vmatprep.mubr.f32.mxu0 %v316_v10  ;;  %v326_v14 = vld [vmem:[%s1085_s23 + $0x40] sm:$0xff]  ;;  %v329_v18 = vld [vmem:[%s1085_s23 + $0x58] sm:$0xff] }
  0x5e   : > { %647 = vmatpush3.bf16.msra.mxu0 %v644_v4  ;;  %v656_v13 = vpack.c.bf16 %v325_v12, %v324_v11  ;;  %v660_v16 = vpack.c.bf16 %v327_v15, %v326_v14  ;;  %v328_v17 = vld [vmem:[%s1085_s23 + $0x50] sm:$0xff]  ;;  %v330_v20 = vld [vmem:[%s1085_s23 + $0x60] sm:$0xff]  ;;  %v331_v21 = vld [vmem:[%s1085_s23 + $0x68] sm:$0xff] }
  0x5f   : > { %649 = vmatprep.subr.bf16.mxu0 %v648_v6  ;;  %v664_v19 = vpack.c.bf16 %v329_v18, %v328_v17  ;;  %v668_v22 = vpack.c.bf16 %v331_v21, %v330_v20  ;;  %v332_v23 = vld [vmem:[%s1085_s23 + $0x70] sm:$0xff]  ;;  %v333_v24 = vld [vmem:[%s1085_s23 + $0x78] sm:$0xff]  ;;  %v315_v27 = vld [vmem:[#allocation7 + $0x8] sm:$0xff] }
  0x60   : > { %v672_v25 = vpack.c.bf16 %v333_v24, %v332_v23  ;;  %v317_v26 = vld [vmem:[%s1079_s14 + $0x8] sm:$0xff]  ;;  %v314_v28 = vld [vmem:[#allocation7] sm:$0xff] }
  0x61   : > { %v584_v34 = vld [vmem:[%s1165_s2] ss:$0 sm:$0xff] (!%p583_p12) }
  0x62   : > { %651 = vmatpush3.bf16.msra.mxu0 %v648_v6  ;;  %v585_v35 = vld [vmem:[%s1166_s3] ss:$0 sm:$0xff] (!%p583_p12) }
  0x63   : > { %653 = vmatprep.subr.bf16.mxu0 %v652_v9 }
  0x66   : > { %655 = vmatpush3.bf16.msra.mxu0 %v652_v9 }
  0x67   : > { %657 = vmatprep.subr.bf16.mxu0 %v656_v13 }
  0x6a   : > { %659 = vmatpush3.bf16.msra.mxu0 %v656_v13 }
  0x6b   : > { %661 = vmatprep.subr.bf16.mxu0 %v660_v16 }
  0x6e   : > { %663 = vmatpush3.bf16.msra.mxu0 %v660_v16 }
  0x6f   : > { %665 = vmatprep.subr.bf16.mxu0 %v664_v19 }
  0x72   : > { %667 = vmatpush3.bf16.msra.mxu0 %v664_v19 }
  0x73   : > { %669 = vmatprep.subr.bf16.mxu0 %v668_v22 }
  0x76   : > { %671 = vmatpush3.bf16.msra.mxu0 %v668_v22 }
  0x77   : > { %673 = vmatprep.subr.bf16.mxu0 %v672_v25 }
  0x7a   : > { %675 = vmatpush3.bf16.msra.mxu0 %v672_v25 }
  0x7d   : > { %642 = vmatmul.mubr.f32.vlgmr.msra.gmra.mrb[0].mxu0 %v317_v26 }
 0x14e   : > { %416 = sbr.rel (%p583_p12) target bundleno = 353 (0x161), region = 52 }
 0x150   : > { %v643_v29 = vpop.f32.mrb[0].mxu0 }
 0x151   : > { %v410_v30 = vadd.f32 %v643_v29, %v315_v27  ;;  %v400_v31 = vpop.f32.mrb[1].mxu0 }
 0x152   : > { %v409_v32 = vadd.f32 %v400_v31, %v314_v28 }
 0x153   : > { %412 = vst [vmem:[#allocation7 + $0x8] sm:$0xff] %v410_v30 }
 0x154   : > { %411 = vst [vmem:[#allocation7] sm:$0xff] %v409_v32 }
 0x15a   : > { %v418_v37 = vld [vmem:[#allocation7 + $0x8] sm:$0xff] }
 0x15b   : > { %v417_v33 = vld [vmem:[#allocation7] sm:$0xff]  ;;  %v427_v38 = vmul.f32 %v584_v34, %v418_v37 }
 0x15c   : > { %v426_v36 = vmul.f32 %v584_v34, %v417_v33 }
 0x15d   : > { %v436_v40 = vadd.f32 %v585_v35, %v427_v38 }
 0x15e   : > { %v435_v39 = vadd.f32 %v585_v35, %v426_v36 }
 0x15f   : > { %438 = vst [vmem:[#allocation7 + $0x8] sm:$0xff] %v436_v40 }
 0x160   : > { %437 = vst [vmem:[#allocation7] sm:$0xff] %v435_v39 }
 0x161 PF: > { %p1119_p4 = scmp.eq.s32.totalorder %s569_s21, 1  ;;  %s901_s25 = smov [#allocation7]  }
 0x162   : > { %s449_s30 = sshll.u32 %s901_s25, 4  ;;  %s450_s30 = int_to_ptr.vmem [resolvable:$true] %s449_s30 }
 0x163   : > { %s809_s7 = scalar_lea.vmem %s450_s30, 256  ;;  %p816_p10 = scmp.lt.s32.totalorder %s450_s30, %s450_s30 }
 0x164   : > { %p810_p8 = scmp.ne.s32.totalorder %s450_s30, %s809_s7  ;;  %p817_p0 = scmp.lt.s32.totalorder %s809_s7, %s809_s7 }
 0x166   : > { %p811_p2 = pnand %p810_p8, %p1119_p4  ;;  %p818_p5 = por %p817_p0, %p816_p10 }
 0x168   : > { %p812_p3 = pneg %p811_p2 }
 0x16a   : > { %p819_p6 = pnand %p818_p5, %p812_p3 }
 0x16c   : > { %822 = shalt.err (!%p819_p6)
}
 0x16d   : > { %s823_s21 = scalar_lea.hbm %s1167_s4, 256 }
 0x16e   : > { %p824_p11 = scmp.ne.s32.totalorder %s1167_s4, %s823_s21  ;;  %p829_p7 = scmp.lt.u32.totalorder %s823_s21, %s1167_s4 }
 0x170   : > { %p825_p13 = pnand %p824_p11, %p1119_p4 }
 0x172   : > { %p826_p1 = pneg %p825_p13 }
 0x174   : > { %p831_p9 = pnand %p829_p7, %p826_p1 }
 0x176   : > { %834 = shalt.err (!%p831_p9)
}
 0x177   : > { %s902_s6 = smov 128   ;;  %s903_s14 = smov 8  }
 0x178   : > { %681 = dma.vmem_to_hbm [thread:$0]  (%p1119_p4), %s450_s30, 256, %s1167_s4, [#allocation4], %s902_s6, %s902_s6, %s903_s14  }
 0x179   : > { %868 = dma.done.wait (%p1119_p4), [#allocation4], 256  }
 0x17a   : > { %870 = vsyncadd (%p1119_p4), [#allocation4], 4294967040 }
 0x17b PF: > { %s21_s20 = sadd.s32 1, %s893_s20   ;;  %s1176_s15 = smov %s877_s16 }
 0x17c   : > { %p18_p12 = scmp.ge.s32.totalorder %s21_s20, 4   ;;  %s1177_s16 = smov %s881_s17 }
 0x17d   : > { %s1178_s17 = smov %s980_s27  ;;  %s1179_s18 = smov %s889_s19 }
 0x17e   : > { %s1180_s19 = smov %s1182_s22  ;;  %20 = sbr.rel (!%p18_p12) target bundleno = 7 (0x7), region = 101 }
 0x185   :  { %465 = vsyncpa [#allocation3], 1 }
 0x186   :  { %467 = vsyncpa [#allocation3 + $0x1], 1 }
 0x187   :  { %468 = vsyncpa [#allocation6], 1 }
 0x188   :  { %470 = vsyncpa [#allocation6 + $0x1], 1 }
 0x189   :  { %471 = vsyncpa [#allocation4], 1 }
 0x18a   :  { %473 = vsyncpa [#allocation4 + $0x1], 1 }

</bundles_post_ra>
